<compile_context>
chip_gen: v5e
topology: v5e:2x2
jax: 0.10.0
libtpu: 0.0.40
codegen_flags: <defaults>
</compile_context>

<pallas_src>
import functools

import jax
import jax.numpy as jnp
from jax.experimental import pallas as pl
from jax.experimental.pallas import tpu as pltpu


def _coord_att_kernel(h, x_ref, pool_ref, pscale_ref, selh_ref, selw_ref,
                      w1_ref, b1_ref, wh_ref, ww_ref, b2_ref, o_ref):
    """One row-block: rows = batch_block * channels, lanes = h*w."""
    hpw = pool_ref.shape[1]                                    # h + w

    x = x_ref[...]                                             # (rows, hw), x dtype

    # ---- coordinate pooling: one lane-dense MXU dot; exact scaling in f32.
    pooled = jnp.dot(x, pool_ref[...], preferred_element_type=jnp.float32)
    pooled = pooled * pscale_ref[...]                          # (rows, h+w) f32

    # ---- conv1 (1x1) + bias + ReLU: one block-diagonal (I ⊗ w1) matmul.
    y = jnp.dot(w1_ref[...], pooled, preferred_element_type=jnp.float32)
    y = jnp.maximum(y + b1_ref[...], 0.0)                      # (nb*mip, h+w) f32

    # ---- conv_h / conv_w: two block-diagonal matmuls over all columns, then
    # select per column (t < h -> conv_h path, t >= h -> conv_w path) + sigmoid.
    ah_pre = jnp.dot(wh_ref[...], y, preferred_element_type=jnp.float32)
    aw_pre = jnp.dot(ww_ref[...], y, preferred_element_type=jnp.float32)
    col = jax.lax.broadcasted_iota(jnp.int32, (1, hpw), 1)
    a = jax.nn.sigmoid(jnp.where(col < h, ah_pre, aw_pre) + b2_ref[...])  # (rows, h+w)

    # ---- expand gates to the lane-dense hw axis with 0/1-selection matmuls
    # (exact) in the input dtype, and gate x in place.
    a_x = a.astype(x.dtype)
    g_h = jnp.dot(a_x, selh_ref[...])                          # (rows, hw), x dtype
    g_w = jnp.dot(a_x, selw_ref[...])                          # (rows, hw), x dtype
    o_ref[...] = (x * g_h * g_w).astype(o_ref.dtype)


def coord_att(x, w1, b1, wh, bh, ww, bw, *, batch_block=None):
    """CoordAtt forward. x: (n, c, h, w); w1: (mip, c); b1: (mip,);
    wh/ww: (c, mip); bh/bw: (c,)."""
    n, c, h, w = x.shape
    hw = h * w
    hpw = h + w
    mip = w1.shape[0]
    itemsize = x.dtype.itemsize
    f32 = jnp.float32

    # Lane-dense, sublane-dense layout: fold channels into the row dim.
    xf = x.reshape(n * c, hw)

    # ---------------- batch-block / VMEM sizing -----------------------------
    bytes_per_batch = c * hw * itemsize

    def const_bytes(bb):
        return (hw * hpw * itemsize                    # pooling 0/1 matrix
                + hpw * 4                              # pooling scale row (f32)
                + 2 * hpw * hw * itemsize              # expansion 0/1 matrices
                + (bb * mip) * (bb * c) * 4            # block-diag conv1 weight
                + (bb * mip) * hpw * 4                 # conv1 bias slab
                + 2 * (bb * c) * (bb * mip) * 4        # block-diag conv_h / conv_w
                + (bb * c) * hpw * 4)                  # [bh|bw] bias slab

    def resident_bytes(bb):
        io = 4 * bb * bytes_per_batch                  # double-buffered x in + out
        live = 3 * bb * bytes_per_batch                # g_h, g_w, gated product
        small = 6 * (bb * c) * hpw * 4                 # pooled-domain f32 temps
        return io + live + small + 2 * const_bytes(bb)

    try:  # 64 MiB/TC (v7x-safe) default if the query is unavailable.
        vmem_cap = int(getattr(pltpu.get_tpu_info(), "vmem_capacity_bytes", 64 << 20))
    except Exception:
        vmem_cap = 64 << 20
    vmem_cap = max(min(vmem_cap, 128 << 20), 32 << 20)
    budget = (vmem_cap * 6) // 10                      # headroom for Mosaic scratch

    if batch_block is None:
        cands = [bb for bb in range(1, n + 1)
                 if n % bb == 0 and (((bb * c) % 8 == 0) or bb == n)]
        fitting = [bb for bb in cands if resident_bytes(bb) <= budget] or [min(cands)]
        pref = [bb for bb in fitting if bb * c <= 256] or fitting  # 1 MXU row-tile
        multi = [bb for bb in pref if n // bb >= 2]    # >=2 steps: megacore + overlap
        batch_block = max(multi) if multi else max(pref)
    row_block = batch_block * c
    grid = (n // batch_block,)

    vmem_limit = int(min(max(resident_bytes(batch_block) + (8 << 20), 32 << 20),
                         max(vmem_cap - (8 << 20), 32 << 20)))

    # ---------------- constant operands (built once in the wrapper) ---------
    ii = jnp.arange(hw, dtype=jnp.int32) // w          # flattened pixel -> row idx
    jj = jnp.arange(hw, dtype=jnp.int32) % w           # flattened pixel -> col idx
    sel_h = (ii[:, None] == jnp.arange(h, dtype=jnp.int32)[None, :]).astype(x.dtype)
    sel_w = (jj[:, None] == jnp.arange(w, dtype=jnp.int32)[None, :]).astype(x.dtype)
    pool01 = jnp.concatenate([sel_h, sel_w], axis=1)                     # (hw, h+w)
    pscale = jnp.concatenate([jnp.full((h,), 1.0 / w, dtype=f32),
                              jnp.full((w,), 1.0 / h, dtype=f32)]).reshape(1, hpw)
    selh_full = jnp.concatenate([sel_h.T, jnp.zeros((w, hw), x.dtype)], axis=0)
    selw_full = jnp.concatenate([jnp.zeros((h, hw), x.dtype), sel_w.T], axis=0)

    eye_b = jnp.eye(batch_block, dtype=f32)
    w1bd = jnp.kron(eye_b, w1.astype(f32))             # (bb*mip, bb*c)
    whbd = jnp.kron(eye_b, wh.astype(f32))             # (bb*c, bb*mip)
    wwbd = jnp.kron(eye_b, ww.astype(f32))             # (bb*c, bb*mip)
    b1bd = jnp.broadcast_to(jnp.tile(b1.astype(f32), batch_block)[:, None],
                            (batch_block * mip, hpw))
    colv = jnp.arange(hpw, dtype=jnp.int32)[None, :]
    bsel = jnp.where(colv < h,
                     jnp.tile(bh.astype(f32), batch_block)[:, None],
                     jnp.tile(bw.astype(f32), batch_block)[:, None])     # (bb*c, h+w)

    kernel = functools.partial(_coord_att_kernel, h)
    args = (xf, pool01, pscale, selh_full, selw_full, w1bd, b1bd, whbd, wwbd, bsel)

    def make_call(single_buffer_consts):
        def const_spec(arr):
            if single_buffer_consts:
                return pl.BlockSpec(arr.shape, lambda b: (0, 0),
                                    pipeline_mode=pl.Buffered(1))
            return pl.BlockSpec(arr.shape, lambda b: (0, 0))

        in_specs = ([pl.BlockSpec((row_block, hw), lambda b: (b, 0))]
                    + [const_spec(a) for a in args[1:]])
        return pl.pallas_call(
            kernel,
            out_shape=jax.ShapeDtypeStruct((n * c, hw), x.dtype),
            grid=grid,
            in_specs=in_specs,
            out_specs=pl.BlockSpec((row_block, hw), lambda b: (b, 0)),
            compiler_params=pltpu.CompilerParams(
                dimension_semantics=("parallel",),
                vmem_limit_bytes=vmem_limit,
            ),
        )

    try:
        out2d = make_call(True)(*args)       # constants single-buffered
    except Exception:
        out2d = make_call(False)(*args)      # fallback: default double-buffering
    return out2d.reshape(n, c, h, w)


def coord_att_reference(x, w1, b1, wh, bh, ww, bw):
    """Pure-JAX reference mirroring the PyTorch forward (for verification)."""
    n, c, h, w = x.shape
    x_h = jnp.mean(x, axis=3)                                    # (n, c, h)
    x_w = jnp.mean(x, axis=2)                                    # (n, c, w)
    y = jnp.concatenate([x_h, x_w], axis=2)                      # (n, c, h+w)
    y = jnp.einsum('mc,nct->nmt', w1, y) + b1[None, :, None]
    y = jnp.maximum(y, 0.0)
    yh, yw = y[:, :, :h], y[:, :, h:]                            # (n, mip, h/w)
    a_h = jax.nn.sigmoid(jnp.einsum('cm,nmt->nct', wh, yh) + bh[None, :, None])
    a_w = jax.nn.sigmoid(jnp.einsum('cm,nmt->nct', ww, yw) + bw[None, :, None])
    return x * a_h[:, :, :, None] * a_w[:, :, None, :]


if __name__ == "__main__":
    # Module config: inp = oup = 4 channels, reduction = 32 -> mip = max(8, 4//32) = 8
    n, c, h, w = 2, 4, 16, 16
    reduction = 32
    mip = max(8, c // reduction)

    key = jax.random.PRNGKey(0)
    kx, k1, k2, k3, k4, k5, k6 = jax.random.split(key, 7)

    x = jax.random.normal(kx, (n, c, h, w), dtype=jnp.float32)

    # 1x1 conv weights squeezed to 2-D, biases 1-D (as in nn.Conv2d).
    w1 = 0.1 * jax.random.normal(k1, (mip, c), dtype=jnp.float32)
    b1 = 0.1 * jax.random.normal(k2, (mip,), dtype=jnp.float32)
    wh = 0.1 * jax.random.normal(k3, (c, mip), dtype=jnp.float32)
    bh = 0.1 * jax.random.normal(k4, (c,), dtype=jnp.float32)
    ww = 0.1 * jax.random.normal(k5, (c, mip), dtype=jnp.float32)
    bw = 0.1 * jax.random.normal(k6, (c,), dtype=jnp.float32)

    out = coord_att(x, w1, b1, wh, bh, ww, bw)
    out = jax.block_until_ready(out)

    ref = coord_att_reference(x, w1, b1, wh, bh, ww, bw)
    assert out.shape == (n, c, h, w)
    assert jnp.allclose(out, ref, atol=1e-4, rtol=1e-4), "mismatch vs reference"

    print("KERNEL_OK")
</pallas_src>

<mosaic_0001>
module attributes {stable_mosaic.version = 11 : i64} {
  func.func @_coord_att_kernel(%arg0: i32, %arg1: memref<8x256xf32, #tpu.memory_space<vmem>>, %arg2: memref<256x32xf32, #tpu.memory_space<vmem>>, %arg3: memref<1x32xf32, #tpu.memory_space<vmem>>, %arg4: memref<32x256xf32, #tpu.memory_space<vmem>>, %arg5: memref<32x256xf32, #tpu.memory_space<vmem>>, %arg6: memref<16x8xf32, #tpu.memory_space<vmem>>, %arg7: memref<16x32xf32, #tpu.memory_space<vmem>>, %arg8: memref<8x16xf32, #tpu.memory_space<vmem>>, %arg9: memref<8x16xf32, #tpu.memory_space<vmem>>, %arg10: memref<8x32xf32, #tpu.memory_space<vmem>>, %arg11: memref<8x256xf32, #tpu.memory_space<vmem>>) attributes {dimension_semantics = [#tpu.dimension_semantics<parallel>], iteration_bounds = array<i64: 1>, scalar_prefetch = 0 : i64, scratch_operands = 0 : i64, tpu.core_type = #tpu.core_type<tc>, window_params = [{transform_indices = @transform_0, window_bounds = array<i64: 8, 256>}, {pipeline_mode = #tpu.pipeline_mode<synchronous>, transform_indices = @transform_1, window_bounds = array<i64: 256, 32>}, {pipeline_mode = #tpu.pipeline_mode<synchronous>, transform_indices = @transform_2, window_bounds = array<i64: 1, 32>}, {pipeline_mode = #tpu.pipeline_mode<synchronous>, transform_indices = @transform_3, window_bounds = array<i64: 32, 256>}, {pipeline_mode = #tpu.pipeline_mode<synchronous>, transform_indices = @transform_4, window_bounds = array<i64: 32, 256>}, {pipeline_mode = #tpu.pipeline_mode<synchronous>, transform_indices = @transform_5, window_bounds = array<i64: 16, 8>}, {pipeline_mode = #tpu.pipeline_mode<synchronous>, transform_indices = @transform_6, window_bounds = array<i64: 16, 32>}, {pipeline_mode = #tpu.pipeline_mode<synchronous>, transform_indices = @transform_7, window_bounds = array<i64: 8, 16>}, {pipeline_mode = #tpu.pipeline_mode<synchronous>, transform_indices = @transform_8, window_bounds = array<i64: 8, 16>}, {pipeline_mode = #tpu.pipeline_mode<synchronous>, transform_indices = @transform_9, window_bounds = array<i64: 8, 32>}, {transform_indices = @transform_10, window_bounds = array<i64: 8, 256>}]} {
    %c0 = arith.constant 0 : index
    %c0_0 = arith.constant 0 : index
    %0 = vector.load %arg1[%c0, %c0_0] : memref<8x256xf32, #tpu.memory_space<vmem>>, vector<8x256xf32>
    %c0_1 = arith.constant 0 : index
    %c0_2 = arith.constant 0 : index
    %1 = vector.load %arg2[%c0_1, %c0_2] : memref<256x32xf32, #tpu.memory_space<vmem>>, vector<256x32xf32>
    %cst = arith.constant dense<0.000000e+00> : vector<8x32xf32>
    %2 = tpu.matmul %0, %1, %cst {dimension_numbers = #tpu.dot_dimension_numbers<[1], [0], [0], [1], [0, 0, 1, 1], [], []>} : vector<8x256xf32>, vector<256x32xf32>, vector<8x32xf32> -> vector<8x32xf32>
    %c0_3 = arith.constant 0 : index
    %c0_4 = arith.constant 0 : index
    %3 = vector.load %arg3[%c0_3, %c0_4] : memref<1x32xf32, #tpu.memory_space<vmem>>, vector<1x32xf32>
    %4 = vector.broadcast %3 : vector<1x32xf32> to vector<8x32xf32>
    %5 = arith.mulf %2, %4 : vector<8x32xf32>
    %c0_5 = arith.constant 0 : index
    %c0_6 = arith.constant 0 : index
    %6 = vector.load %arg6[%c0_5, %c0_6] : memref<16x8xf32, #tpu.memory_space<vmem>>, vector<16x8xf32>
    %cst_7 = arith.constant dense<0.000000e+00> : vector<16x32xf32>
    %7 = tpu.matmul %6, %5, %cst_7 {dimension_numbers = #tpu.dot_dimension_numbers<[1], [0], [0], [1], [0, 0, 1, 1], [], []>} : vector<16x8xf32>, vector<8x32xf32>, vector<16x32xf32> -> vector<16x32xf32>
    %c0_8 = arith.constant 0 : index
    %c0_9 = arith.constant 0 : index
    %8 = vector.load %arg7[%c0_8, %c0_9] : memref<16x32xf32, #tpu.memory_space<vmem>>, vector<16x32xf32>
    %9 = arith.addf %7, %8 : vector<16x32xf32>
    %cst_10 = arith.constant 0.000000e+00 : f32
    %10 = vector.broadcast %cst_10 : f32 to vector<16x32xf32>
    %11 = arith.maximumf %9, %10 : vector<16x32xf32>
    %c0_11 = arith.constant 0 : index
    %c0_12 = arith.constant 0 : index
    %12 = vector.load %arg8[%c0_11, %c0_12] : memref<8x16xf32, #tpu.memory_space<vmem>>, vector<8x16xf32>
    %cst_13 = arith.constant dense<0.000000e+00> : vector<8x32xf32>
    %13 = tpu.matmul %12, %11, %cst_13 {dimension_numbers = #tpu.dot_dimension_numbers<[1], [0], [0], [1], [0, 0, 1, 1], [], []>} : vector<8x16xf32>, vector<16x32xf32>, vector<8x32xf32> -> vector<8x32xf32>
    %c0_14 = arith.constant 0 : index
    %c0_15 = arith.constant 0 : index
    %14 = vector.load %arg9[%c0_14, %c0_15] : memref<8x16xf32, #tpu.memory_space<vmem>>, vector<8x16xf32>
    %cst_16 = arith.constant dense<0.000000e+00> : vector<8x32xf32>
    %15 = tpu.matmul %14, %11, %cst_16 {dimension_numbers = #tpu.dot_dimension_numbers<[1], [0], [0], [1], [0, 0, 1, 1], [], []>} : vector<8x16xf32>, vector<16x32xf32>, vector<8x32xf32> -> vector<8x32xf32>
    %16 = tpu.iota {dimensions = array<i32: 1>} : vector<1x32xi32>
    %c16_i32 = arith.constant 16 : i32
    %17 = vector.broadcast %c16_i32 : i32 to vector<1x32xi32>
    %18 = arith.cmpi slt, %16, %17 : vector<1x32xi32>
    %19 = vector.shape_cast %18 : vector<1x32xi1> to vector<1x32xi1>
    %20 = vector.broadcast %19 : vector<1x32xi1> to vector<8x32xi1>
    %21 = arith.select %20, %13, %15 : vector<8x32xi1>, vector<8x32xf32>
    %c0_17 = arith.constant 0 : index
    %c0_18 = arith.constant 0 : index
    %22 = vector.load %arg10[%c0_17, %c0_18] : memref<8x32xf32, #tpu.memory_space<vmem>>, vector<8x32xf32>
    %23 = arith.addf %21, %22 : vector<8x32xf32>
    %24 = arith.negf %23 : vector<8x32xf32>
    %25 = math.exp %24 : vector<8x32xf32>
    %cst_19 = arith.constant 1.000000e+00 : f32
    %26 = vector.broadcast %cst_19 : f32 to vector<8x32xf32>
    %27 = arith.addf %26, %25 : vector<8x32xf32>
    %28 = arith.divf %26, %27 : vector<8x32xf32>
    %c0_20 = arith.constant 0 : index
    %c0_21 = arith.constant 0 : index
    %29 = vector.load %arg4[%c0_20, %c0_21] : memref<32x256xf32, #tpu.memory_space<vmem>>, vector<32x256xf32>
    %cst_22 = arith.constant dense<0.000000e+00> : vector<8x256xf32>
    %30 = tpu.matmul %28, %29, %cst_22 {dimension_numbers = #tpu.dot_dimension_numbers<[1], [0], [0], [1], [0, 0, 1, 1], [], []>} : vector<8x32xf32>, vector<32x256xf32>, vector<8x256xf32> -> vector<8x256xf32>
    %c0_23 = arith.constant 0 : index
    %c0_24 = arith.constant 0 : index
    %31 = vector.load %arg5[%c0_23, %c0_24] : memref<32x256xf32, #tpu.memory_space<vmem>>, vector<32x256xf32>
    %cst_25 = arith.constant dense<0.000000e+00> : vector<8x256xf32>
    %32 = tpu.matmul %28, %31, %cst_25 {dimension_numbers = #tpu.dot_dimension_numbers<[1], [0], [0], [1], [0, 0, 1, 1], [], []>} : vector<8x32xf32>, vector<32x256xf32>, vector<8x256xf32> -> vector<8x256xf32>
    %33 = arith.mulf %0, %30 : vector<8x256xf32>
    %34 = arith.mulf %33, %32 : vector<8x256xf32>
    %c0_26 = arith.constant 0 : index
    %c0_27 = arith.constant 0 : index
    %35 = vector.load %arg11[%c0_26, %c0_27] : memref<8x256xf32, #tpu.memory_space<vmem>>, vector<8x256xf32>
    tpu.vector_store %arg11[%c0_26, %c0_27], %34 {strides = array<i32>} : memref<8x256xf32, #tpu.memory_space<vmem>>, vector<8x256xf32>,
    return
  }
  func.func @transform_0(%arg0: i32) -> (i32, i32) {
    %c0_i32 = arith.constant 0 : i32
    %c0_i32_0 = arith.constant 0 : i32
    return %arg0, %c0_i32 : i32, i32
  }
  func.func @transform_1(%arg0: i32) -> (i32, i32) {
    %c0_i32 = arith.constant 0 : i32
    %c0_i32_0 = arith.constant 0 : i32
    %c0_i32_1 = arith.constant 0 : i32
    return %c0_i32, %c0_i32_0 : i32, i32
  }
  func.func @transform_2(%arg0: i32) -> (i32, i32) {
    %c0_i32 = arith.constant 0 : i32
    %c0_i32_0 = arith.constant 0 : i32
    %c0_i32_1 = arith.constant 0 : i32
    return %c0_i32, %c0_i32_0 : i32, i32
  }
  func.func @transform_3(%arg0: i32) -> (i32, i32) {
    %c0_i32 = arith.constant 0 : i32
    %c0_i32_0 = arith.constant 0 : i32
    %c0_i32_1 = arith.constant 0 : i32
    return %c0_i32, %c0_i32_0 : i32, i32
  }
  func.func @transform_4(%arg0: i32) -> (i32, i32) {
    %c0_i32 = arith.constant 0 : i32
    %c0_i32_0 = arith.constant 0 : i32
    %c0_i32_1 = arith.constant 0 : i32
    return %c0_i32, %c0_i32_0 : i32, i32
  }
  func.func @transform_5(%arg0: i32) -> (i32, i32) {
    %c0_i32 = arith.constant 0 : i32
    %c0_i32_0 = arith.constant 0 : i32
    %c0_i32_1 = arith.constant 0 : i32
    return %c0_i32, %c0_i32_0 : i32, i32
  }
  func.func @transform_6(%arg0: i32) -> (i32, i32) {
    %c0_i32 = arith.constant 0 : i32
    %c0_i32_0 = arith.constant 0 : i32
    %c0_i32_1 = arith.constant 0 : i32
    return %c0_i32, %c0_i32_0 : i32, i32
  }
  func.func @transform_7(%arg0: i32) -> (i32, i32) {
    %c0_i32 = arith.constant 0 : i32
    %c0_i32_0 = arith.constant 0 : i32
    %c0_i32_1 = arith.constant 0 : i32
    return %c0_i32, %c0_i32_0 : i32, i32
  }
  func.func @transform_8(%arg0: i32) -> (i32, i32) {
    %c0_i32 = arith.constant 0 : i32
    %c0_i32_0 = arith.constant 0 : i32
    %c0_i32_1 = arith.constant 0 : i32
    return %c0_i32, %c0_i32_0 : i32, i32
  }
  func.func @transform_9(%arg0: i32) -> (i32, i32) {
    %c0_i32 = arith.constant 0 : i32
    %c0_i32_0 = arith.constant 0 : i32
    %c0_i32_1 = arith.constant 0 : i32
    return %c0_i32, %c0_i32_0 : i32, i32
  }
  func.func @transform_10(%arg0: i32) -> (i32, i32) {
    %c0_i32 = arith.constant 0 : i32
    %c0_i32_0 = arith.constant 0 : i32
    return %arg0, %c0_i32 : i32, i32
  }
}

module attributes {stable_mosaic.version = 11 : i64} {
  func.func @_coord_att_kernel(%arg0: i32, %arg1: memref<8x256xf32, #tpu.memory_space<vmem>>, %arg2: memref<256x32xf32, #tpu.memory_space<vmem>>, %arg3: memref<1x32xf32, #tpu.memory_space<vmem>>, %arg4: memref<32x256xf32, #tpu.memory_space<vmem>>, %arg5: memref<32x256xf32, #tpu.memory_space<vmem>>, %arg6: memref<16x8xf32, #tpu.memory_space<vmem>>, %arg7: memref<16x32xf32, #tpu.memory_space<vmem>>, %arg8: memref<8x16xf32, #tpu.memory_space<vmem>>, %arg9: memref<8x16xf32, #tpu.memory_space<vmem>>, %arg10: memref<8x32xf32, #tpu.memory_space<vmem>>, %arg11: memref<8x256xf32, #tpu.memory_space<vmem>>) attributes {dimension_semantics = [#tpu.dimension_semantics<parallel>], iteration_bounds = array<i64: 1>, scalar_prefetch = 0 : i64, scratch_operands = 0 : i64, tpu.core_type = #tpu.core_type<tc>, window_params = [{transform_indices = @transform_0, window_bounds = array<i64: 8, 256>}, {pipeline_mode = #tpu.pipeline_mode<synchronous>, transform_indices = @transform_1, window_bounds = array<i64: 256, 32>}, {pipeline_mode = #tpu.pipeline_mode<synchronous>, transform_indices = @transform_2, window_bounds = array<i64: 1, 32>}, {pipeline_mode = #tpu.pipeline_mode<synchronous>, transform_indices = @transform_3, window_bounds = array<i64: 32, 256>}, {pipeline_mode = #tpu.pipeline_mode<synchronous>, transform_indices = @transform_4, window_bounds = array<i64: 32, 256>}, {pipeline_mode = #tpu.pipeline_mode<synchronous>, transform_indices = @transform_5, window_bounds = array<i64: 16, 8>}, {pipeline_mode = #tpu.pipeline_mode<synchronous>, transform_indices = @transform_6, window_bounds = array<i64: 16, 32>}, {pipeline_mode = #tpu.pipeline_mode<synchronous>, transform_indices = @transform_7, window_bounds = array<i64: 8, 16>}, {pipeline_mode = #tpu.pipeline_mode<synchronous>, transform_indices = @transform_8, window_bounds = array<i64: 8, 16>}, {pipeline_mode = #tpu.pipeline_mode<synchronous>, transform_indices = @transform_9, window_bounds = array<i64: 8, 32>}, {transform_indices = @transform_10, window_bounds = array<i64: 8, 256>}]} {
    %c0 = arith.constant 0 : index
    %c0_0 = arith.constant 0 : index
    %0 = vector.load %arg1[%c0, %c0_0] : memref<8x256xf32, #tpu.memory_space<vmem>>, vector<8x256xf32>
    %c0_1 = arith.constant 0 : index
    %c0_2 = arith.constant 0 : index
    %1 = vector.load %arg2[%c0_1, %c0_2] : memref<256x32xf32, #tpu.memory_space<vmem>>, vector<256x32xf32>
    %cst = arith.constant dense<0.000000e+00> : vector<8x32xf32>
    %2 = tpu.matmul %0, %1, %cst {dimension_numbers = #tpu.dot_dimension_numbers<[1], [0], [0], [1], [0, 0, 1, 1], [], []>} : vector<8x256xf32>, vector<256x32xf32>, vector<8x32xf32> -> vector<8x32xf32>
    %c0_3 = arith.constant 0 : index
    %c0_4 = arith.constant 0 : index
    %3 = vector.load %arg3[%c0_3, %c0_4] : memref<1x32xf32, #tpu.memory_space<vmem>>, vector<1x32xf32>
    %4 = vector.broadcast %3 : vector<1x32xf32> to vector<8x32xf32>
    %5 = arith.mulf %2, %4 : vector<8x32xf32>
    %c0_5 = arith.constant 0 : index
    %c0_6 = arith.constant 0 : index
    %6 = vector.load %arg6[%c0_5, %c0_6] : memref<16x8xf32, #tpu.memory_space<vmem>>, vector<16x8xf32>
    %cst_7 = arith.constant dense<0.000000e+00> : vector<16x32xf32>
    %7 = tpu.matmul %6, %5, %cst_7 {dimension_numbers = #tpu.dot_dimension_numbers<[1], [0], [0], [1], [0, 0, 1, 1], [], []>} : vector<16x8xf32>, vector<8x32xf32>, vector<16x32xf32> -> vector<16x32xf32>
    %c0_8 = arith.constant 0 : index
    %c0_9 = arith.constant 0 : index
    %8 = vector.load %arg7[%c0_8, %c0_9] : memref<16x32xf32, #tpu.memory_space<vmem>>, vector<16x32xf32>
    %9 = arith.addf %7, %8 : vector<16x32xf32>
    %cst_10 = arith.constant 0.000000e+00 : f32
    %10 = vector.broadcast %cst_10 : f32 to vector<16x32xf32>
    %11 = arith.maximumf %9, %10 : vector<16x32xf32>
    %c0_11 = arith.constant 0 : index
    %c0_12 = arith.constant 0 : index
    %12 = vector.load %arg8[%c0_11, %c0_12] : memref<8x16xf32, #tpu.memory_space<vmem>>, vector<8x16xf32>
    %cst_13 = arith.constant dense<0.000000e+00> : vector<8x32xf32>
    %13 = tpu.matmul %12, %11, %cst_13 {dimension_numbers = #tpu.dot_dimension_numbers<[1], [0], [0], [1], [0, 0, 1, 1], [], []>} : vector<8x16xf32>, vector<16x32xf32>, vector<8x32xf32> -> vector<8x32xf32>
    %c0_14 = arith.constant 0 : index
    %c0_15 = arith.constant 0 : index
    %14 = vector.load %arg9[%c0_14, %c0_15] : memref<8x16xf32, #tpu.memory_space<vmem>>, vector<8x16xf32>
    %cst_16 = arith.constant dense<0.000000e+00> : vector<8x32xf32>
    %15 = tpu.matmul %14, %11, %cst_16 {dimension_numbers = #tpu.dot_dimension_numbers<[1], [0], [0], [1], [0, 0, 1, 1], [], []>} : vector<8x16xf32>, vector<16x32xf32>, vector<8x32xf32> -> vector<8x32xf32>
    %16 = tpu.iota {dimensions = array<i32: 1>} : vector<1x32xi32>
    %c16_i32 = arith.constant 16 : i32
    %17 = vector.broadcast %c16_i32 : i32 to vector<1x32xi32>
    %18 = arith.cmpi slt, %16, %17 : vector<1x32xi32>
    %19 = vector.shape_cast %18 : vector<1x32xi1> to vector<1x32xi1>
    %20 = vector.broadcast %19 : vector<1x32xi1> to vector<8x32xi1>
    %21 = arith.select %20, %13, %15 : vector<8x32xi1>, vector<8x32xf32>
    %c0_17 = arith.constant 0 : index
    %c0_18 = arith.constant 0 : index
    %22 = vector.load %arg10[%c0_17, %c0_18] : memref<8x32xf32, #tpu.memory_space<vmem>>, vector<8x32xf32>
    %23 = arith.addf %21, %22 : vector<8x32xf32>
    %24 = arith.negf %23 : vector<8x32xf32>
    %25 = math.exp %24 : vector<8x32xf32>
    %cst_19 = arith.constant 1.000000e+00 : f32
    %26 = vector.broadcast %cst_19 : f32 to vector<8x32xf32>
    %27 = arith.addf %26, %25 : vector<8x32xf32>
    %28 = arith.divf %26, %27 : vector<8x32xf32>
    %c0_20 = arith.constant 0 : index
    %c0_21 = arith.constant 0 : index
    %29 = vector.load %arg4[%c0_20, %c0_21] : memref<32x256xf32, #tpu.memory_space<vmem>>, vector<32x256xf32>
    %cst_22 = arith.constant dense<0.000000e+00> : vector<8x256xf32>
    %30 = tpu.matmul %28, %29, %cst_22 {dimension_numbers = #tpu.dot_dimension_numbers<[1], [0], [0], [1], [0, 0, 1, 1], [], []>} : vector<8x32xf32>, vector<32x256xf32>, vector<8x256xf32> -> vector<8x256xf32>
    %c0_23 = arith.constant 0 : index
    %c0_24 = arith.constant 0 : index
    %31 = vector.load %arg5[%c0_23, %c0_24] : memref<32x256xf32, #tpu.memory_space<vmem>>, vector<32x256xf32>
    %cst_25 = arith.constant dense<0.000000e+00> : vector<8x256xf32>
    %32 = tpu.matmul %28, %31, %cst_25 {dimension_numbers = #tpu.dot_dimension_numbers<[1], [0], [0], [1], [0, 0, 1, 1], [], []>} : vector<8x32xf32>, vector<32x256xf32>, vector<8x256xf32> -> vector<8x256xf32>
    %33 = arith.mulf %0, %30 : vector<8x256xf32>
    %34 = arith.mulf %33, %32 : vector<8x256xf32>
    %c0_26 = arith.constant 0 : index
    %c0_27 = arith.constant 0 : index
    %35 = vector.load %arg11[%c0_26, %c0_27] : memref<8x256xf32, #tpu.memory_space<vmem>>, vector<8x256xf32>
    tpu.vector_store %arg11[%c0_26, %c0_27], %34 {strides = array<i32>} : memref<8x256xf32, #tpu.memory_space<vmem>>, vector<8x256xf32>,
    return
  }
  func.func @transform_0(%arg0: i32) -> (i32, i32) {
    %c0_i32 = arith.constant 0 : i32
    %c0_i32_0 = arith.constant 0 : i32
    return %arg0, %c0_i32 : i32, i32
  }
  func.func @transform_1(%arg0: i32) -> (i32, i32) {
    %c0_i32 = arith.constant 0 : i32
    %c0_i32_0 = arith.constant 0 : i32
    %c0_i32_1 = arith.constant 0 : i32
    return %c0_i32, %c0_i32_0 : i32, i32
  }
  func.func @transform_2(%arg0: i32) -> (i32, i32) {
    %c0_i32 = arith.constant 0 : i32
    %c0_i32_0 = arith.constant 0 : i32
    %c0_i32_1 = arith.constant 0 : i32
    return %c0_i32, %c0_i32_0 : i32, i32
  }
  func.func @transform_3(%arg0: i32) -> (i32, i32) {
    %c0_i32 = arith.constant 0 : i32
    %c0_i32_0 = arith.constant 0 : i32
    %c0_i32_1 = arith.constant 0 : i32
    return %c0_i32, %c0_i32_0 : i32, i32
  }
  func.func @transform_4(%arg0: i32) -> (i32, i32) {
    %c0_i32 = arith.constant 0 : i32
    %c0_i32_0 = arith.constant 0 : i32
    %c0_i32_1 = arith.constant 0 : i32
    return %c0_i32, %c0_i32_0 : i32, i32
  }
  func.func @transform_5(%arg0: i32) -> (i32, i32) {
    %c0_i32 = arith.constant 0 : i32
    %c0_i32_0 = arith.constant 0 : i32
    %c0_i32_1 = arith.constant 0 : i32
    return %c0_i32, %c0_i32_0 : i32, i32
  }
  func.func @transform_6(%arg0: i32) -> (i32, i32) {
    %c0_i32 = arith.constant 0 : i32
    %c0_i32_0 = arith.constant 0 : i32
    %c0_i32_1 = arith.constant 0 : i32
    return %c0_i32, %c0_i32_0 : i32, i32
  }
  func.func @transform_7(%arg0: i32) -> (i32, i32) {
    %c0_i32 = arith.constant 0 : i32
    %c0_i32_0 = arith.constant 0 : i32
    %c0_i32_1 = arith.constant 0 : i32
    return %c0_i32, %c0_i32_0 : i32, i32
  }
  func.func @transform_8(%arg0: i32) -> (i32, i32) {
    %c0_i32 = arith.constant 0 : i32
    %c0_i32_0 = arith.constant 0 : i32
    %c0_i32_1 = arith.constant 0 : i32
    return %c0_i32, %c0_i32_0 : i32, i32
  }
  func.func @transform_9(%arg0: i32) -> (i32, i32) {
    %c0_i32 = arith.constant 0 : i32
    %c0_i32_0 = arith.constant 0 : i32
    %c0_i32_1 = arith.constant 0 : i32
    return %c0_i32, %c0_i32_0 : i32, i32
  }
  func.func @transform_10(%arg0: i32) -> (i32, i32) {
    %c0_i32 = arith.constant 0 : i32
    %c0_i32_0 = arith.constant 0 : i32
    return %arg0, %c0_i32 : i32, i32
  }
}

</mosaic_0001>

<bundles_post_ra>
// kernel: tpu_custom_call.1
= control target key start
LH: loop header
LB: loop body
LE: loop exit
PB: predicated region body
PF: predicated region fallthrough
CT: control target
= control target key end

     0   :  { %s631_s0 = inlined_call_operand.vmem [shape: f32[8,256], index: 0, kind: input, shape index: {}]   ;;  %s632_s1 = inlined_call_operand.vmem [shape: f32[256,32], index: 1, kind: input, shape index: {}]   ;;  %s633_s2 = inlined_call_operand.vmem [shape: f32[1,32], index: 2, kind: input, shape index: {}]   ;;  %s634_s3 = inlined_call_operand.vmem [shape: f32[32,256], index: 3, kind: input, shape index: {}]   ;;  %s635_s4 = inlined_call_operand.vmem [shape: f32[32,256], index: 4, kind: input, shape index: {}]   ;;  %s636_s5 = inlined_call_operand.vmem [shape: f32[16,8], index: 5, kind: input, shape index: {}]   ;;  %s637_s6 = inlined_call_operand.vmem [shape: f32[16,32], index: 6, kind: input, shape index: {}]   ;;  %s638_s7 = inlined_call_operand.vmem [shape: f32[8,16], index: 7, kind: input, shape index: {}]   ;;  %s639_s8 = inlined_call_operand.vmem [shape: f32[8,16], index: 8, kind: input, shape index: {}]   ;;  %s640_s9 = inlined_call_operand.vmem [shape: f32[8,32], index: 9, kind: input, shape index: {}]   ;;  %s641_s10 = inlined_call_operand.hbm [shape: f32[8,256], index: 10, kind: output, shape index: {}]  }
   0x1   :  { %v53_v0 = vld [vmem:[%s632_s1 + $0x78] sm:$0xff]  ;;  %v52_v2 = vld [vmem:[%s632_s1 + $0x70] sm:$0xff]  ;;  %v51_v4 = vld [vmem:[%s632_s1 + $0x68] sm:$0xff] }
   0x2   :  { %v69_v1 = vld [vmem:[%s632_s1 + $0xf8] sm:$0xff]  ;;  %70 = vmatpush.msra.mxu0 %v53_v0  ;;  %v68_v3 = vld [vmem:[%s632_s1 + $0xf0] sm:$0xff]  ;;  %v67_v5 = vld [vmem:[%s632_s1 + $0xe8] sm:$0xff] }
   0x3   :  { %90 = vmatpush.msra.mxu1 %v69_v1  ;;  %v50_v6 = vld [vmem:[%s632_s1 + $0x60] sm:$0xff]  ;;  %v49_v8 = vld [vmem:[%s632_s1 + $0x58] sm:$0xff]  ;;  %v48_v10 = vld [vmem:[%s632_s1 + $0x50] sm:$0xff] }
   0x4   :  { %71 = vmatpush.msra.mxu0 %v52_v2  ;;  %v66_v7 = vld [vmem:[%s632_s1 + $0xe0] sm:$0xff]  ;;  %v65_v9 = vld [vmem:[%s632_s1 + $0xd8] sm:$0xff]  ;;  %v64_v11 = vld [vmem:[%s632_s1 + $0xd0] sm:$0xff] }
   0x5   :  { %91 = vmatpush.msra.mxu1 %v68_v3  ;;  %v47_v12 = vld [vmem:[%s632_s1 + $0x48] sm:$0xff] }
   0x6   :  { %72 = vmatpush.msra.mxu0 %v51_v4  ;;  %v63_v13 = vld [vmem:[%s632_s1 + $0xc8] sm:$0xff] }
   0x7   :  { %92 = vmatpush.msra.mxu1 %v67_v5 }
   0x8   :  { %73 = vmatpush.msra.mxu0 %v50_v6 }
   0x9   :  { %93 = vmatpush.msra.mxu1 %v66_v7 }
   0xa   :  { %74 = vmatpush.msra.mxu0 %v49_v8 }
   0xb   :  { %94 = vmatpush.msra.mxu1 %v65_v9 }
   0xc   :  { %75 = vmatpush.msra.mxu0 %v48_v10 }
   0xd   :  { %95 = vmatpush.msra.mxu1 %v64_v11 }
   0xe   :  { %15 = vsyncpa [#allocation3], 0  ;;  %v46_v14 = vld [vmem:[%s632_s1 + $0x40] sm:$0xff]  ;;  %76 = vmatpush.msra.mxu0 %v47_v12  ;;  %v45_v16 = vld [vmem:[%s632_s1 + $0x38] sm:$0xff]  ;;  %vm119_vm0 = vcmask 64512   ;;  %vm152_vm1 = vcmask 130048   ;;  %v200_v59 = vlaneseq }
   0xf   :  { %v62_v15 = vld [vmem:[%s632_s1 + $0xc0] sm:$0xff]  ;;  %96 = vmatpush.msra.mxu1 %v63_v13  ;;  %v61_v17 = vld [vmem:[%s632_s1 + $0xb8] sm:$0xff]  ;;  %v44_v18 = vld [vmem:[%s632_s1 + $0x30] sm:$0xff]  ;;  %vm235_vm6 = vcmask 261120   ;;  %s340_s17 = sshll.u32 %s641_s10, 4  ;;  %s341_s17 = int_to_ptr.hbm [resolvable:$true] %s340_s17 }
  0x10   :  { %77 = vmatpush.msra.mxu0 %v46_v14  ;;  %v60_v19 = vld [vmem:[%s632_s1 + $0xb0] sm:$0xff]  ;;  %v43_v20 = vld [vmem:[%s632_s1 + $0x28] sm:$0xff]  ;;  %v42_v22 = vld [vmem:[%s632_s1 + $0x20] sm:$0xff]  ;;  %v201_v61 = vand.u32 127, %v200_v59 }
  0x11   :  { %97 = vmatpush.msra.mxu1 %v62_v15  ;;  %v59_v21 = vld [vmem:[%s632_s1 + $0xa8] sm:$0xff]  ;;  %v58_v23 = vld [vmem:[%s632_s1 + $0xa0] sm:$0xff]  ;;  %v41_v24 = vld [vmem:[%s632_s1 + $0x18] sm:$0xff] }
  0x12   :  { %78 = vmatpush.msra.mxu0 %v45_v16  ;;  %v57_v25 = vld [vmem:[%s632_s1 + $0x98] sm:$0xff]  ;;  %v40_v26 = vld [vmem:[%s632_s1 + $0x10] sm:$0xff]  ;;  %v39_v28 = vld [vmem:[%s632_s1 + $0x8] sm:$0xff]  ;;  %vm202_vm2 = vcmp.lt.s32.totalorder %v201_v61, 16 }
  0x13   :  { %98 = vmatpush.msra.mxu1 %v61_v17  ;;  %v56_v27 = vld [vmem:[%s632_s1 + $0x90] sm:$0xff]  ;;  %v55_v29 = vld [vmem:[%s632_s1 + $0x88] sm:$0xff]  ;;  %v38_v30 = vld [vmem:[%s632_s1] sm:$0xff] }
  0x14   :  { %79 = vmatpush.msra.mxu0 %v44_v18  ;;  %v54_v31 = vld [vmem:[%s632_s1 + $0x80] sm:$0xff]  ;;  %v550_v33 = vld [vmem:[%s631_s0 + $0x8] sm:$0xff]  ;;  %v233_v51 = vld [vmem:[%s634_s3 + $0x30] sm:$0xff] }
  0x15   :  { %99 = vmatpush.msra.mxu1 %v60_v19  ;;  %v545_v32 = vld [vmem:[%s631_s0] sm:$0xff]  ;;  %v116_v40 = vld [vmem:[%s636_s5 + $0x8] sm:$0xff]  ;;  %v234_v53 = vld [vmem:[%s634_s3 + $0x38] sm:$0xff] }
  0x16   :  { %80 = vmatpush.msra.mxu0 %v43_v20  ;;  %v359_v34 = vld [vmem:[%s633_s2] ss:$0 sm:$0xff]  ;;  %v118_v43 = vld [vmem:[%s637_s6 + $0x8] sm:$0xff]  ;;  %v229_v55 = vld [vmem:[%s634_s3 + $0x10] sm:$0xff] }
  0x17   :  { %100 = vmatpush.msra.mxu1 %v59_v21  ;;  %v115_v39 = vld [vmem:[%s636_s5] sm:$0xff]  ;;  %v232_v54 = vld [vmem:[%s634_s3 + $0x28] sm:$0xff]  ;;  %v230_v56 = vld [vmem:[%s634_s3 + $0x18] sm:$0xff] }
  0x18   :  { %81 = vmatpush.msra.mxu0 %v42_v22  ;;  %v117_v42 = vld [vmem:[%s637_s6] sm:$0xff]  ;;  %v228_v58 = vld [vmem:[%s634_s3 + $0x8] sm:$0xff]  ;;  %v285_v0 = vld [vmem:[%s635_s4 + $0x30] sm:$0xff] }
  0x19   :  { %101 = vmatpush.msra.mxu1 %v58_v23  ;;  %v151_v49 = vld [vmem:[%s638_s7] sm:$0xff]  ;;  %v286_v1 = vld [vmem:[%s635_s4 + $0x38] sm:$0xff]  ;;  %v284_v4 = vld [vmem:[%s635_s4 + $0x28] sm:$0xff] }
  0x1a   :  { %82 = vmatpush.msra.mxu0 %v41_v24  ;;  %v176_v50 = vld [vmem:[%s639_s8] sm:$0xff]  ;;  %v281_v6 = vld [vmem:[%s635_s4 + $0x10] sm:$0xff]  ;;  %v282_v7 = vld [vmem:[%s635_s4 + $0x18] sm:$0xff] }
  0x1b   :  { %102 = vmatpush.msra.mxu1 %v57_v25  ;;  %v231_v52 = vld [vmem:[%s634_s3 + $0x20] sm:$0xff]  ;;  %v280_v10 = vld [vmem:[%s635_s4 + $0x8] sm:$0xff] }
  0x1c   :  { %83 = vmatpush.msra.mxu0 %v40_v26  ;;  %v227_v57 = vld [vmem:[%s634_s3] sm:$0xff] }
  0x1d   :  { %103 = vmatpush.msra.mxu1 %v56_v27  ;;  %v206_v62 = vld [vmem:[%s640_s9] sm:$0xff] }
  0x1e   :  { %84 = vmatpush.msra.mxu0 %v39_v28  ;;  %v283_v2 = vld [vmem:[%s635_s4 + $0x20] sm:$0xff] }
  0x1f   :  { %104 = vmatpush.msra.mxu1 %v55_v29  ;;  %v279_v9 = vld [vmem:[%s635_s4] sm:$0xff]  ;;  %s390_s4 = smov [#allocation2]  }
  0x20   :  { %85 = vmatpush.msra.mxu0 %v38_v30  ;;  %s338_s14 = sshll.u32 %s390_s4, 4  ;;  %s339_s14 = int_to_ptr.vmem [resolvable:$true] %s338_s14 }
  0x21   :  { %105 = vmatpush.msra.mxu1 %v54_v31  ;;  %86 = vmatmul.f32.vlgmr.msra.gmra.mxu0 %v545_v32 }
  0x22   :  { %106 = vmatmul.f32.vlgmr.msra.gmra.mxu1 %v550_v33 }
  0x9e   :  { %v87_v35 = vpop.f32.mrf.mxu0 }
  0x9f   :  { %v107_v36 = vpop.f32.mrf.mxu1 }
  0xa0   :  { %v108_v37 = vadd.f32 %v107_v36, %v87_v35 }
  0xa2   :  { %v114_v38 = vmul.f32 %v359_v34, %v108_v37 }
  0xa4   :  { %141 = vmatpush.msra.mxu2 %v114_v38 }
  0xa5   :  { %349 = vmatmul.msk.f32.vlgmr.msra.gmra.mxu2 %vm119_vm0, %v115_v39 }
  0xa6   :  { %251 = vmatpush.msrb.mxu2 %v233_v51 }
  0xa8   :  { %252 = vmatpush.msrb.mxu2 %v231_v52 }
  0xaa   :  { %253 = vmatpush.msrb.mxu2 %v229_v55 }
  0xac   :  { %254 = vmatpush.msrb.mxu2 %v227_v57 }
  0xad   :  { %350 = vmatmul.msk.f32.gmra.mxu2 %vm119_vm0, %v116_v40 }
  0xae   :  { %299 = vmatpush.msra.mxu2 %v285_v0 }
  0xb0   :  { %300 = vmatpush.msra.mxu2 %v283_v2 }
  0xb2   :  { %301 = vmatpush.msra.mxu2 %v281_v6 }
  0xb4   :  { %302 = vmatpush.msra.mxu2 %v279_v9 }
 0x128   :  { %v143_v41 = vpop.f32.mrf.mxu2 }
 0x129   :  { %v144_v45 = vadd.f32 %v143_v41, %v117_v42 }
 0x12b   :  { %v149_v48 = vmax.f32 %v144_v45, 0.0 }
 0x130   :  { %v146_v44 = vpop.f32.mrf.mxu2 }
 0x131   :  { %v147_v46 = vadd.f32 %v146_v44, %v118_v43 }
 0x133   :  { %v150_v47 = vmax.f32 %v147_v46, 0.0 }
 0x135   :  { %170 = vmatpush.msra.mxu3 %v150_v47 }
 0x137   :  { %171 = vmatpush.msra.mxu3 %v149_v48 }
 0x138   :  { %351 = vmatmul.msk.f32.vlgmr.msra.gmra.mxu3 %vm152_vm1, %v151_v49 }
 0x139   :  { %194 = vmatpush.msrb.mxu3 %v150_v47 }
 0x13b   :  { %195 = vmatpush.msrb.mxu3 %v149_v48 }
 0x13d   :  { %271 = vmatpush.msra.mxu3 %v234_v53 }
 0x13f   :  { %272 = vmatpush.msra.mxu3 %v232_v54 }
 0x140   :  { %352 = vmatmul.msk.f32.vlgmr.msrb.gmra.mxu3 %vm152_vm1, %v176_v50 }
 0x141   :  { %273 = vmatpush.msra.mxu3 %v230_v56 }
 0x143   :  { %274 = vmatpush.msra.mxu3 %v228_v58 }
 0x145   :  { %319 = vmatpush.msrb.mxu3 %v286_v1 }
 0x147   :  { %320 = vmatpush.msrb.mxu3 %v284_v4 }
 0x149   :  { %321 = vmatpush.msrb.mxu3 %v282_v7 }
 0x14b   :  { %322 = vmatpush.msrb.mxu3 %v280_v10 }
 0x1bb   :  { %v173_v60 = vpop.f32.mrf.mxu3 }
 0x1c3   :  { %v197_v63 = vpop.f32.mrf.mxu3 }
 0x1c4   :  { %v205_v3 = vsel %vm202_vm2, %v173_v60, %v197_v63 }
 0x1c5   :  { %v207_v5 = vadd.f32 %v206_v62, %v205_v3 }
 0x1c7   :  { %v353_v8 = vmul.f32 -1.442695, %v207_v5 }
 0x1c9   :  { %360 = vpow2.f32 %v353_v8 }
 0x1cf   :  { %v361_v11 = vpop.eup %360 }
 0x1d0   :  { %v211_v12 = vadd.f32 1.0, %v361_v11 }
 0x1d2   :  { %362 = vrcp.f32 %v211_v12  ;;  %v223_v16 = vand.u32 2147483648, %v211_v12  ;;  %v221_v18 = vand.u32 2147483647, %v211_v12  ;;  %vm217_vm4 = vweird.f32 %v211_v12 }
 0x1d4   :  { %v224_v20 = vor.u32 1.1754944e-38, %v223_v16  ;;  %vm222_vm7 = vcmp.eq.f32.partialorder %v221_v18, 8.507059e+37 }
 0x1d8   :  { %v363_v13 = vpop.eup %362 }
 0x1d9   :  { %v213_v14 = vmul.f32 %v363_v13, %v211_v12  ;;  %vm218_vm3 = vweird.f32 %v363_v13 }
 0x1da   :  { %vm219_vm5 = vmor %vm217_vm4, %vm218_vm3 }
 0x1db   :  { %v214_v15 = vsub.f32 1.0, %v213_v14 }
 0x1dd   :  { %v215_v17 = vmul.f32 %v363_v13, %v214_v15 }
 0x1df   :  { %v216_v19 = vadd.f32 %v363_v13, %v215_v17 }
 0x1e1   :  { %v220_v21 = vsel %vm219_vm5, %v363_v13, %v216_v19 }
 0x1e2   :  { %v225_v22 = vsel %vm222_vm7, %v224_v20, %v220_v21 }
 0x1e3   :  { %354 = vmatmul.msk.f32.vlgmr.msrb.gmra.mxu2 %vm235_vm6, %v225_v22  ;;  %355 = vmatmul.msk.f32.vlgmr.msra.gmra.mxu3 %vm235_vm6, %v225_v22 }
 0x1eb   :  { %356 = vmatmul.msk.f32.vlgmr.msra.gmra.mxu2 %vm235_vm6, %v225_v22  ;;  %357 = vmatmul.msk.f32.vlgmr.msrb.gmra.mxu3 %vm235_vm6, %v225_v22 }
 0x266   :  { %v256_v23 = vpop.f32.mrf.mxu2  ;;  %v276_v24 = vpop.f32.mrf.mxu3 }
 0x267   :  { %v327_v25 = vmul.f32 %v256_v23, %v545_v32  ;;  %v328_v26 = vmul.f32 %v276_v24, %v550_v33 }
 0x26e   :  { %v304_v27 = vpop.f32.mrf.mxu2  ;;  %v324_v28 = vpop.f32.mrf.mxu3 }
 0x26f   :  { %v329_v29 = vmul.f32 %v327_v25, %v304_v27  ;;  %v330_v30 = vmul.f32 %v328_v26, %v324_v28 }
 0x271   :  { %331 = vst [vmem:[#allocation2] sm:$0xff] %v329_v29 }
 0x272   :  { %332 = vst [vmem:[#allocation2 + $0x8] sm:$0xff] %v330_v30 }
 0x273   :  { %343 = dma.vmem_to_hbm [thread:$0]  %s339_s14, 256, %s341_s17, [#allocation3]  }
 0x274   :  { %388 = dma.done.wait [#allocation3], 256  }
 0x275   :  { %389 = vsyncadd [#allocation3], 4294967040 }
 0x276   :  { %348 = vsyncpa [#allocation3], 1 }

// kernel: tpu_custom_call.1
= control target key start
LH: loop header
LB: loop body
LE: loop exit
PB: predicated region body
PF: predicated region fallthrough
CT: control target
= control target key end

     0   :  { %s631_s0 = inlined_call_operand.vmem [shape: f32[8,256], index: 0, kind: input, shape index: {}]   ;;  %s632_s1 = inlined_call_operand.vmem [shape: f32[256,32], index: 1, kind: input, shape index: {}]   ;;  %s633_s2 = inlined_call_operand.vmem [shape: f32[1,32], index: 2, kind: input, shape index: {}]   ;;  %s634_s3 = inlined_call_operand.vmem [shape: f32[32,256], index: 3, kind: input, shape index: {}]   ;;  %s635_s4 = inlined_call_operand.vmem [shape: f32[32,256], index: 4, kind: input, shape index: {}]   ;;  %s636_s5 = inlined_call_operand.vmem [shape: f32[16,8], index: 5, kind: input, shape index: {}]   ;;  %s637_s6 = inlined_call_operand.vmem [shape: f32[16,32], index: 6, kind: input, shape index: {}]   ;;  %s638_s7 = inlined_call_operand.vmem [shape: f32[8,16], index: 7, kind: input, shape index: {}]   ;;  %s639_s8 = inlined_call_operand.vmem [shape: f32[8,16], index: 8, kind: input, shape index: {}]   ;;  %s640_s9 = inlined_call_operand.vmem [shape: f32[8,32], index: 9, kind: input, shape index: {}]   ;;  %s641_s10 = inlined_call_operand.hbm [shape: f32[8,256], index: 10, kind: output, shape index: {}]  }
   0x1   :  { %v53_v0 = vld [vmem:[%s632_s1 + $0x78] sm:$0xff]  ;;  %v52_v2 = vld [vmem:[%s632_s1 + $0x70] sm:$0xff]  ;;  %v51_v4 = vld [vmem:[%s632_s1 + $0x68] sm:$0xff] }
   0x2   :  { %v69_v1 = vld [vmem:[%s632_s1 + $0xf8] sm:$0xff]  ;;  %70 = vmatpush.msra.mxu0 %v53_v0  ;;  %v68_v3 = vld [vmem:[%s632_s1 + $0xf0] sm:$0xff]  ;;  %v67_v5 = vld [vmem:[%s632_s1 + $0xe8] sm:$0xff] }
   0x3   :  { %90 = vmatpush.msra.mxu1 %v69_v1  ;;  %v50_v6 = vld [vmem:[%s632_s1 + $0x60] sm:$0xff]  ;;  %v49_v8 = vld [vmem:[%s632_s1 + $0x58] sm:$0xff]  ;;  %v48_v10 = vld [vmem:[%s632_s1 + $0x50] sm:$0xff] }
   0x4   :  { %71 = vmatpush.msra.mxu0 %v52_v2  ;;  %v66_v7 = vld [vmem:[%s632_s1 + $0xe0] sm:$0xff]  ;;  %v65_v9 = vld [vmem:[%s632_s1 + $0xd8] sm:$0xff]  ;;  %v64_v11 = vld [vmem:[%s632_s1 + $0xd0] sm:$0xff] }
   0x5   :  { %91 = vmatpush.msra.mxu1 %v68_v3  ;;  %v47_v12 = vld [vmem:[%s632_s1 + $0x48] sm:$0xff] }
   0x6   :  { %72 = vmatpush.msra.mxu0 %v51_v4  ;;  %v63_v13 = vld [vmem:[%s632_s1 + $0xc8] sm:$0xff] }
   0x7   :  { %92 = vmatpush.msra.mxu1 %v67_v5 }
   0x8   :  { %73 = vmatpush.msra.mxu0 %v50_v6 }
   0x9   :  { %93 = vmatpush.msra.mxu1 %v66_v7 }
   0xa   :  { %74 = vmatpush.msra.mxu0 %v49_v8 }
   0xb   :  { %94 = vmatpush.msra.mxu1 %v65_v9 }
   0xc   :  { %75 = vmatpush.msra.mxu0 %v48_v10 }
   0xd   :  { %95 = vmatpush.msra.mxu1 %v64_v11 }
   0xe   :  { %15 = vsyncpa [#allocation3], 0  ;;  %v46_v14 = vld [vmem:[%s632_s1 + $0x40] sm:$0xff]  ;;  %76 = vmatpush.msra.mxu0 %v47_v12  ;;  %v45_v16 = vld [vmem:[%s632_s1 + $0x38] sm:$0xff]  ;;  %vm119_vm0 = vcmask 64512   ;;  %vm152_vm1 = vcmask 130048   ;;  %v200_v59 = vlaneseq }
   0xf   :  { %v62_v15 = vld [vmem:[%s632_s1 + $0xc0] sm:$0xff]  ;;  %96 = vmatpush.msra.mxu1 %v63_v13  ;;  %v61_v17 = vld [vmem:[%s632_s1 + $0xb8] sm:$0xff]  ;;  %v44_v18 = vld [vmem:[%s632_s1 + $0x30] sm:$0xff]  ;;  %vm235_vm6 = vcmask 261120   ;;  %s340_s17 = sshll.u32 %s641_s10, 4  ;;  %s341_s17 = int_to_ptr.hbm [resolvable:$true] %s340_s17 }
  0x10   :  { %77 = vmatpush.msra.mxu0 %v46_v14  ;;  %v60_v19 = vld [vmem:[%s632_s1 + $0xb0] sm:$0xff]  ;;  %v43_v20 = vld [vmem:[%s632_s1 + $0x28] sm:$0xff]  ;;  %v42_v22 = vld [vmem:[%s632_s1 + $0x20] sm:$0xff]  ;;  %v201_v61 = vand.u32 127, %v200_v59 }
  0x11   :  { %97 = vmatpush.msra.mxu1 %v62_v15  ;;  %v59_v21 = vld [vmem:[%s632_s1 + $0xa8] sm:$0xff]  ;;  %v58_v23 = vld [vmem:[%s632_s1 + $0xa0] sm:$0xff]  ;;  %v41_v24 = vld [vmem:[%s632_s1 + $0x18] sm:$0xff] }
  0x12   :  { %78 = vmatpush.msra.mxu0 %v45_v16  ;;  %v57_v25 = vld [vmem:[%s632_s1 + $0x98] sm:$0xff]  ;;  %v40_v26 = vld [vmem:[%s632_s1 + $0x10] sm:$0xff]  ;;  %v39_v28 = vld [vmem:[%s632_s1 + $0x8] sm:$0xff]  ;;  %vm202_vm2 = vcmp.lt.s32.totalorder %v201_v61, 16 }
  0x13   :  { %98 = vmatpush.msra.mxu1 %v61_v17  ;;  %v56_v27 = vld [vmem:[%s632_s1 + $0x90] sm:$0xff]  ;;  %v55_v29 = vld [vmem:[%s632_s1 + $0x88] sm:$0xff]  ;;  %v38_v30 = vld [vmem:[%s632_s1] sm:$0xff] }
  0x14   :  { %79 = vmatpush.msra.mxu0 %v44_v18  ;;  %v54_v31 = vld [vmem:[%s632_s1 + $0x80] sm:$0xff]  ;;  %v550_v33 = vld [vmem:[%s631_s0 + $0x8] sm:$0xff]  ;;  %v233_v51 = vld [vmem:[%s634_s3 + $0x30] sm:$0xff] }
  0x15   :  { %99 = vmatpush.msra.mxu1 %v60_v19  ;;  %v545_v32 = vld [vmem:[%s631_s0] sm:$0xff]  ;;  %v116_v40 = vld [vmem:[%s636_s5 + $0x8] sm:$0xff]  ;;  %v234_v53 = vld [vmem:[%s634_s3 + $0x38] sm:$0xff] }
  0x16   :  { %80 = vmatpush.msra.mxu0 %v43_v20  ;;  %v359_v34 = vld [vmem:[%s633_s2] ss:$0 sm:$0xff]  ;;  %v118_v43 = vld [vmem:[%s637_s6 + $0x8] sm:$0xff]  ;;  %v229_v55 = vld [vmem:[%s634_s3 + $0x10] sm:$0xff] }
  0x17   :  { %100 = vmatpush.msra.mxu1 %v59_v21  ;;  %v115_v39 = vld [vmem:[%s636_s5] sm:$0xff]  ;;  %v232_v54 = vld [vmem:[%s634_s3 + $0x28] sm:$0xff]  ;;  %v230_v56 = vld [vmem:[%s634_s3 + $0x18] sm:$0xff] }
  0x18   :  { %81 = vmatpush.msra.mxu0 %v42_v22  ;;  %v117_v42 = vld [vmem:[%s637_s6] sm:$0xff]  ;;  %v228_v58 = vld [vmem:[%s634_s3 + $0x8] sm:$0xff]  ;;  %v285_v0 = vld [vmem:[%s635_s4 + $0x30] sm:$0xff] }
  0x19   :  { %101 = vmatpush.msra.mxu1 %v58_v23  ;;  %v151_v49 = vld [vmem:[%s638_s7] sm:$0xff]  ;;  %v286_v1 = vld [vmem:[%s635_s4 + $0x38] sm:$0xff]  ;;  %v284_v4 = vld [vmem:[%s635_s4 + $0x28] sm:$0xff] }
  0x1a   :  { %82 = vmatpush.msra.mxu0 %v41_v24  ;;  %v176_v50 = vld [vmem:[%s639_s8] sm:$0xff]  ;;  %v281_v6 = vld [vmem:[%s635_s4 + $0x10] sm:$0xff]  ;;  %v282_v7 = vld [vmem:[%s635_s4 + $0x18] sm:$0xff] }
  0x1b   :  { %102 = vmatpush.msra.mxu1 %v57_v25  ;;  %v231_v52 = vld [vmem:[%s634_s3 + $0x20] sm:$0xff]  ;;  %v280_v10 = vld [vmem:[%s635_s4 + $0x8] sm:$0xff] }
  0x1c   :  { %83 = vmatpush.msra.mxu0 %v40_v26  ;;  %v227_v57 = vld [vmem:[%s634_s3] sm:$0xff] }
  0x1d   :  { %103 = vmatpush.msra.mxu1 %v56_v27  ;;  %v206_v62 = vld [vmem:[%s640_s9] sm:$0xff] }
  0x1e   :  { %84 = vmatpush.msra.mxu0 %v39_v28  ;;  %v283_v2 = vld [vmem:[%s635_s4 + $0x20] sm:$0xff] }
  0x1f   :  { %104 = vmatpush.msra.mxu1 %v55_v29  ;;  %v279_v9 = vld [vmem:[%s635_s4] sm:$0xff]  ;;  %s390_s4 = smov [#allocation2]  }
  0x20   :  { %85 = vmatpush.msra.mxu0 %v38_v30  ;;  %s338_s14 = sshll.u32 %s390_s4, 4  ;;  %s339_s14 = int_to_ptr.vmem [resolvable:$true] %s338_s14 }
  0x21   :  { %105 = vmatpush.msra.mxu1 %v54_v31  ;;  %86 = vmatmul.f32.vlgmr.msra.gmra.mxu0 %v545_v32 }
  0x22   :  { %106 = vmatmul.f32.vlgmr.msra.gmra.mxu1 %v550_v33 }
  0x9e   :  { %v87_v35 = vpop.f32.mrf.mxu0 }
  0x9f   :  { %v107_v36 = vpop.f32.mrf.mxu1 }
  0xa0   :  { %v108_v37 = vadd.f32 %v107_v36, %v87_v35 }
  0xa2   :  { %v114_v38 = vmul.f32 %v359_v34, %v108_v37 }
  0xa4   :  { %141 = vmatpush.msra.mxu2 %v114_v38 }
  0xa5   :  { %349 = vmatmul.msk.f32.vlgmr.msra.gmra.mxu2 %vm119_vm0, %v115_v39 }
  0xa6   :  { %251 = vmatpush.msrb.mxu2 %v233_v51 }
  0xa8   :  { %252 = vmatpush.msrb.mxu2 %v231_v52 }
  0xaa   :  { %253 = vmatpush.msrb.mxu2 %v229_v55 }
  0xac   :  { %254 = vmatpush.msrb.mxu2 %v227_v57 }
  0xad   :  { %350 = vmatmul.msk.f32.gmra.mxu2 %vm119_vm0, %v116_v40 }
  0xae   :  { %299 = vmatpush.msra.mxu2 %v285_v0 }
  0xb0   :  { %300 = vmatpush.msra.mxu2 %v283_v2 }
  0xb2   :  { %301 = vmatpush.msra.mxu2 %v281_v6 }
  0xb4   :  { %302 = vmatpush.msra.mxu2 %v279_v9 }
 0x128   :  { %v143_v41 = vpop.f32.mrf.mxu2 }
 0x129   :  { %v144_v45 = vadd.f32 %v143_v41, %v117_v42 }
 0x12b   :  { %v149_v48 = vmax.f32 %v144_v45, 0.0 }
 0x130   :  { %v146_v44 = vpop.f32.mrf.mxu2 }
 0x131   :  { %v147_v46 = vadd.f32 %v146_v44, %v118_v43 }
 0x133   :  { %v150_v47 = vmax.f32 %v147_v46, 0.0 }
 0x135   :  { %170 = vmatpush.msra.mxu3 %v150_v47 }
 0x137   :  { %171 = vmatpush.msra.mxu3 %v149_v48 }
 0x138   :  { %351 = vmatmul.msk.f32.vlgmr.msra.gmra.mxu3 %vm152_vm1, %v151_v49 }
 0x139   :  { %194 = vmatpush.msrb.mxu3 %v150_v47 }
 0x13b   :  { %195 = vmatpush.msrb.mxu3 %v149_v48 }
 0x13d   :  { %271 = vmatpush.msra.mxu3 %v234_v53 }
 0x13f   :  { %272 = vmatpush.msra.mxu3 %v232_v54 }
 0x140   :  { %352 = vmatmul.msk.f32.vlgmr.msrb.gmra.mxu3 %vm152_vm1, %v176_v50 }
 0x141   :  { %273 = vmatpush.msra.mxu3 %v230_v56 }
 0x143   :  { %274 = vmatpush.msra.mxu3 %v228_v58 }
 0x145   :  { %319 = vmatpush.msrb.mxu3 %v286_v1 }
 0x147   :  { %320 = vmatpush.msrb.mxu3 %v284_v4 }
 0x149   :  { %321 = vmatpush.msrb.mxu3 %v282_v7 }
 0x14b   :  { %322 = vmatpush.msrb.mxu3 %v280_v10 }
 0x1bb   :  { %v173_v60 = vpop.f32.mrf.mxu3 }
 0x1c3   :  { %v197_v63 = vpop.f32.mrf.mxu3 }
 0x1c4   :  { %v205_v3 = vsel %vm202_vm2, %v173_v60, %v197_v63 }
 0x1c5   :  { %v207_v5 = vadd.f32 %v206_v62, %v205_v3 }
 0x1c7   :  { %v353_v8 = vmul.f32 -1.442695, %v207_v5 }
 0x1c9   :  { %360 = vpow2.f32 %v353_v8 }
 0x1cf   :  { %v361_v11 = vpop.eup %360 }
 0x1d0   :  { %v211_v12 = vadd.f32 1.0, %v361_v11 }
 0x1d2   :  { %362 = vrcp.f32 %v211_v12  ;;  %v223_v16 = vand.u32 2147483648, %v211_v12  ;;  %v221_v18 = vand.u32 2147483647, %v211_v12  ;;  %vm217_vm4 = vweird.f32 %v211_v12 }
 0x1d4   :  { %v224_v20 = vor.u32 1.1754944e-38, %v223_v16  ;;  %vm222_vm7 = vcmp.eq.f32.partialorder %v221_v18, 8.507059e+37 }
 0x1d8   :  { %v363_v13 = vpop.eup %362 }
 0x1d9   :  { %v213_v14 = vmul.f32 %v363_v13, %v211_v12  ;;  %vm218_vm3 = vweird.f32 %v363_v13 }
 0x1da   :  { %vm219_vm5 = vmor %vm217_vm4, %vm218_vm3 }
 0x1db   :  { %v214_v15 = vsub.f32 1.0, %v213_v14 }
 0x1dd   :  { %v215_v17 = vmul.f32 %v363_v13, %v214_v15 }
 0x1df   :  { %v216_v19 = vadd.f32 %v363_v13, %v215_v17 }
 0x1e1   :  { %v220_v21 = vsel %vm219_vm5, %v363_v13, %v216_v19 }
 0x1e2   :  { %v225_v22 = vsel %vm222_vm7, %v224_v20, %v220_v21 }
 0x1e3   :  { %354 = vmatmul.msk.f32.vlgmr.msrb.gmra.mxu2 %vm235_vm6, %v225_v22  ;;  %355 = vmatmul.msk.f32.vlgmr.msra.gmra.mxu3 %vm235_vm6, %v225_v22 }
 0x1eb   :  { %356 = vmatmul.msk.f32.vlgmr.msra.gmra.mxu2 %vm235_vm6, %v225_v22  ;;  %357 = vmatmul.msk.f32.vlgmr.msrb.gmra.mxu3 %vm235_vm6, %v225_v22 }
 0x266   :  { %v256_v23 = vpop.f32.mrf.mxu2  ;;  %v276_v24 = vpop.f32.mrf.mxu3 }
 0x267   :  { %v327_v25 = vmul.f32 %v256_v23, %v545_v32  ;;  %v328_v26 = vmul.f32 %v276_v24, %v550_v33 }
 0x26e   :  { %v304_v27 = vpop.f32.mrf.mxu2  ;;  %v324_v28 = vpop.f32.mrf.mxu3 }
 0x26f   :  { %v329_v29 = vmul.f32 %v327_v25, %v304_v27  ;;  %v330_v30 = vmul.f32 %v328_v26, %v324_v28 }
 0x271   :  { %331 = vst [vmem:[#allocation2] sm:$0xff] %v329_v29 }
 0x272   :  { %332 = vst [vmem:[#allocation2 + $0x8] sm:$0xff] %v330_v30 }
 0x273   :  { %343 = dma.vmem_to_hbm [thread:$0]  %s339_s14, 256, %s341_s17, [#allocation3]  }
 0x274   :  { %388 = dma.done.wait [#allocation3], 256  }
 0x275   :  { %389 = vsyncadd [#allocation3], 4294967040 }
 0x276   :  { %348 = vsyncpa [#allocation3], 1 }

</bundles_post_ra>
